<compile_context>
chip_gen: v7x
topology: tpu7x:2x2x1
jax: 0.10.0
libtpu: 0.0.40
codegen_flags: <defaults>
</compile_context>

<pallas_src>
import functools

import jax
import jax.numpy as jnp
from jax.experimental import pallas as pl
from jax.experimental.pallas import tpu as pltpu

LANE = 128


def _round_up(x, m):
    return ((x + m - 1) // m) * m


def _cdiv(a, b):
    return -(-a // b)


def _sublane_multiple(dtype):
    """Packed-sublane minimum for the dtype: 8 (f32), 16 (bf16/f16), 32 (8-bit)."""
    bits = jnp.dtype(dtype).itemsize * 8
    return max(8, 256 // max(bits, 8))


def _sigmoid(x):
    # 1 EUP push per vreg (vs exp + reciprocal = 2).
    return 0.5 * (jnp.tanh(0.5 * x) + 1.0)


def _detect_num_tensorcores():
    """Best-effort TensorCores-per-chip (2 on v7x, 1 on v5e/v6e); safe fallback 1."""
    objs = []
    try:
        objs.append(pltpu.get_tpu_info())
    except Exception:
        pass
    try:
        objs.append(jax.devices()[0])
    except Exception:
        pass
    for obj in objs:
        for name in ("num_tensorcores", "tensorcore_count", "num_cores",
                     "cores_per_chip", "core_count"):
            v = getattr(obj, name, None)
            if isinstance(v, int) and 1 <= v <= 16:
                return v
    return 1


def _iou_partial_kernel(x_ref, t_ref, inter_ref, total_ref, *,
                        rows, tile_rows, tiles_per_core, ragged):
    """Grid = (core, row_tile).  inter_ref/total_ref are the per-core (8,128)
    partial-sum outputs, resident across the 'arbitrary' row_tile axis."""
    c = pl.program_id(0)
    i = pl.program_id(1)

    @pl.when(i == 0)
    def _():
        inter_ref[...] = jnp.zeros_like(inter_ref)
        total_ref[...] = jnp.zeros_like(total_ref)

    # Global starting row of this grid step (unclamped: overflow tiles of the
    # core split land past `rows` and get fully masked below).
    row0 = (c * tiles_per_core + i) * tile_rows

    def contribute(masked):
        sx = _sigmoid(x_ref[...].astype(jnp.float32))
        tt = t_ref[...].astype(jnp.float32)
        if masked:
            ridx = jax.lax.broadcasted_iota(jnp.int32, (tile_rows, LANE), 0)
            keep = (row0 + ridx) < rows
            sx = jnp.where(keep, sx, 0.0)
            tt = jnp.where(keep, tt, 0.0)
        # Fold the tile into an (8,128) partial with pure cross-vreg VALU adds.
        inter_ref[...] += (sx * tt).reshape(tile_rows // 8, 8, LANE).sum(axis=0)
        total_ref[...] += (sx + tt).reshape(tile_rows // 8, 8, LANE).sum(axis=0)

    if not ragged:
        # Static: every tile is full -> no mask code generated at all.
        contribute(masked=False)
    else:
        is_full = (row0 + tile_rows) <= rows

        @pl.when(is_full)
        def _():
            contribute(masked=False)

        @pl.when(jnp.logical_not(is_full))
        def _():
            contribute(masked=True)


def iou_loss(inputs, targets, smooth=1.0, *, max_tile_rows=1024, num_cores=None):
    """Pallas equivalent of IOULoss.forward(inputs, targets, smooth)."""
    x = jnp.ravel(inputs)
    t = jnp.ravel(targets)
    n = x.shape[0]
    smooth = jnp.float32(smooth)

    rows = n // LANE
    rem = n - rows * LANE

    inter_tail = jnp.float32(0.0)
    total_tail = jnp.float32(0.0)
    if rem:
        # <128-element remainder: tiny plain-JAX correction term instead of
        # padding (and copying) the whole flattened tensor.
        x_tail = x[rows * LANE:].astype(jnp.float32)
        t_tail = t[rows * LANE:].astype(jnp.float32)
        sx_tail = jax.nn.sigmoid(x_tail)
        inter_tail = jnp.sum(sx_tail * t_tail)
        total_tail = jnp.sum(sx_tail + t_tail)
        # TODO(synk): the prefix slice below still materializes a copy when
        # n % 128 != 0; common NCHW shapes (n % 128 == 0) take the copy-free path.
        x = x[: rows * LANE]
        t = t[: rows * LANE]

    if rows == 0:
        inter = inter_tail
        total = total_tail
    else:
        x2 = x.reshape(rows, LANE)
        t2 = t.reshape(rows, LANE)

        sub = max(_sublane_multiple(x2.dtype), _sublane_multiple(t2.dtype))
        tile_rows = min(int(max_tile_rows), _round_up(rows, sub))
        tile_rows = max(sub, (tile_rows // sub) * sub)  # keep a multiple of `sub`

        nt = _cdiv(rows, tile_rows)                      # real row tiles
        ncores = num_cores if num_cores is not None else _detect_num_tensorcores()
        ncores = max(1, min(int(ncores), nt))
        tpc = _cdiv(nt, ncores)                          # tiles per core
        ragged = (rows % tile_rows != 0) or (ncores * tpc != nt)

        def in_map(c, i):
            g = c * tpc + i
            if ncores * tpc != nt:
                g = jnp.minimum(g, nt - 1)   # overflow tiles re-read the last tile
            return (g, 0)                    # (their contribution is masked to 0)

        out_map = lambda c, i: (c, 0, 0)     # one (8,128) partial slab per core

        kernel = functools.partial(
            _iou_partial_kernel,
            rows=int(rows),
            tile_rows=int(tile_rows),
            tiles_per_core=int(tpc),
            ragged=bool(ragged),
        )

        inter_p, total_p = pl.pallas_call(
            kernel,
            out_shape=(
                jax.ShapeDtypeStruct((ncores, 8, LANE), jnp.float32),
                jax.ShapeDtypeStruct((ncores, 8, LANE), jnp.float32),
            ),
            grid_spec=pltpu.PrefetchScalarGridSpec(
                num_scalar_prefetch=0,
                grid=(ncores, tpc),
                in_specs=[
                    pl.BlockSpec((tile_rows, LANE), in_map),
                    pl.BlockSpec((tile_rows, LANE), in_map),
                ],
                out_specs=[
                    pl.BlockSpec((None, 8, LANE), out_map),
                    pl.BlockSpec((None, 8, LANE), out_map),
                ],
            ),
            compiler_params=pltpu.CompilerParams(
                # Core split is parallel; row-tile axis is a running reduction.
                dimension_semantics=("parallel", "arbitrary"),
            ),
        )(x2, t2)

        inter = jnp.sum(inter_p) + inter_tail
        total = jnp.sum(total_p) + total_tail

    union = total - inter
    return 1.0 - (inter + smooth) / (union + smooth)


def _reference_iou_loss(inputs, targets, smooth=1.0):
    x = jax.nn.sigmoid(inputs.astype(jnp.float32)).reshape(-1)
    t = targets.astype(jnp.float32).reshape(-1)
    intersection = jnp.sum(x * t)
    total = jnp.sum(x + t)
    union = total - intersection
    return 1.0 - (intersection + smooth) / (union + smooth)


if __name__ == "__main__":
    key = jax.random.PRNGKey(0)
    k1, k2 = jax.random.split(key)

    # NCHW, small shapes: batch=2, channels=4, spatial=16x16.
    inputs = jax.random.normal(k1, (2, 4, 16, 16), dtype=jnp.float32)
    targets = (jax.random.uniform(k2, (2, 4, 16, 16)) > 0.5).astype(jnp.float32)

    loss = jax.block_until_ready(iou_loss(inputs, targets, smooth=1.0))
    ref = jax.block_until_ready(_reference_iou_loss(inputs, targets, smooth=1.0))

    assert jnp.allclose(loss, ref, rtol=1e-5, atol=1e-5), (loss, ref)
    print("KERNEL_OK")
</pallas_src>

<mosaic_0001>
module attributes {stable_mosaic.version = 11 : i64} {
  func.func @_iou_partial_kernel(%arg0: i32, %arg1: i32, %arg2: memref<16x128xf32, #tpu.memory_space<vmem>>, %arg3: memref<16x128xf32, #tpu.memory_space<vmem>>, %arg4: memref<1x8x128xf32, #tpu.memory_space<vmem>>, %arg5: memref<1x8x128xf32, #tpu.memory_space<vmem>>) attributes {dimension_semantics = [#tpu.dimension_semantics<parallel>, #tpu.dimension_semantics<arbitrary>], iteration_bounds = array<i64: 1, 1>, scalar_prefetch = 0 : i64, scratch_operands = 0 : i64, tpu.core_type = #tpu.core_type<tc>, window_params = [{transform_indices = @transform_0, window_bounds = array<i64: 16, 128>}, {transform_indices = @transform_1, window_bounds = array<i64: 16, 128>}, {transform_indices = @transform_2, window_bounds = array<i64: 1, 8, 128>}, {transform_indices = @transform_3, window_bounds = array<i64: 1, 8, 128>}]} {
    %c0_i32 = arith.constant 0 : i32
    %0 = arith.cmpi eq, %arg1, %c0_i32 : i32
    %1 = arith.extui %0 : i1 to i32
    %c0_i32_0 = arith.constant 0 : i32
    %2 = arith.cmpi ne, %1, %c0_i32_0 : i32
    scf.if %2 {
      %cst_20 = arith.constant 0.000000e+00 : f32
      %30 = vector.broadcast %cst_20 : f32 to vector<8x128xf32>
      %c0_21 = arith.constant 0 : index
      %c0_22 = arith.constant 0 : index
      %c0_23 = arith.constant 0 : index
      %31 = vector.load %arg4[%c0_21, %c0_22, %c0_23] : memref<1x8x128xf32, #tpu.memory_space<vmem>>, vector<1x8x128xf32>
      %32 = vector.shape_cast %31 : vector<1x8x128xf32> to vector<8x128xf32>
      %33 = vector.shape_cast %30 : vector<8x128xf32> to vector<1x8x128xf32>
      tpu.vector_store %arg4[%c0_21, %c0_22, %c0_23], %33 {strides = array<i32>} : memref<1x8x128xf32, #tpu.memory_space<vmem>>, vector<1x8x128xf32>,
      %cst_24 = arith.constant 0.000000e+00 : f32
      %34 = vector.broadcast %cst_24 : f32 to vector<8x128xf32>
      %c0_25 = arith.constant 0 : index
      %c0_26 = arith.constant 0 : index
      %c0_27 = arith.constant 0 : index
      %35 = vector.load %arg5[%c0_25, %c0_26, %c0_27] : memref<1x8x128xf32, #tpu.memory_space<vmem>>, vector<1x8x128xf32>
      %36 = vector.shape_cast %35 : vector<1x8x128xf32> to vector<8x128xf32>
      %37 = vector.shape_cast %34 : vector<8x128xf32> to vector<1x8x128xf32>
      tpu.vector_store %arg5[%c0_25, %c0_26, %c0_27], %37 {strides = array<i32>} : memref<1x8x128xf32, #tpu.memory_space<vmem>>, vector<1x8x128xf32>,
    } else {
    }
    %c0 = arith.constant 0 : index
    %c0_1 = arith.constant 0 : index
    %3 = vector.load %arg2[%c0, %c0_1] : memref<16x128xf32, #tpu.memory_space<vmem>>, vector<16x128xf32>
    %cst = arith.constant 5.000000e-01 : f32
    %4 = vector.broadcast %cst : f32 to vector<16x128xf32>
    %5 = arith.mulf %4, %3 : vector<16x128xf32>
    %6 = math.tanh %5 : vector<16x128xf32>
    %cst_2 = arith.constant 1.000000e+00 : f32
    %7 = vector.broadcast %cst_2 : f32 to vector<16x128xf32>
    %8 = arith.addf %6, %7 : vector<16x128xf32>
    %cst_3 = arith.constant 5.000000e-01 : f32
    %9 = vector.broadcast %cst_3 : f32 to vector<16x128xf32>
    %10 = arith.mulf %9, %8 : vector<16x128xf32>
    %c0_4 = arith.constant 0 : index
    %c0_5 = arith.constant 0 : index
    %11 = vector.load %arg3[%c0_4, %c0_5] : memref<16x128xf32, #tpu.memory_space<vmem>>, vector<16x128xf32>
    %c0_6 = arith.constant 0 : index
    %c0_7 = arith.constant 0 : index
    %c0_8 = arith.constant 0 : index
    %12 = vector.load %arg4[%c0_6, %c0_7, %c0_8] : memref<1x8x128xf32, #tpu.memory_space<vmem>>, vector<1x8x128xf32>
    %13 = vector.shape_cast %12 : vector<1x8x128xf32> to vector<8x128xf32>
    %14 = arith.mulf %10, %11 : vector<16x128xf32>
    %15 = vector.shape_cast %14 : vector<16x128xf32> to vector<2x8x128xf32>
    %cst_9 = arith.constant dense<0.000000e+00> : vector<8x128xf32>
    %16 = vector.multi_reduction <add>, %15, %cst_9 [0] : vector<2x8x128xf32> to vector<8x128xf32>
    %17 = arith.addf %13, %16 : vector<8x128xf32>
    %c0_10 = arith.constant 0 : index
    %c0_11 = arith.constant 0 : index
    %c0_12 = arith.constant 0 : index
    %18 = vector.load %arg4[%c0_10, %c0_11, %c0_12] : memref<1x8x128xf32, #tpu.memory_space<vmem>>, vector<1x8x128xf32>
    %19 = vector.shape_cast %18 : vector<1x8x128xf32> to vector<8x128xf32>
    %20 = vector.shape_cast %17 : vector<8x128xf32> to vector<1x8x128xf32>
    tpu.vector_store %arg4[%c0_10, %c0_11, %c0_12], %20 {strides = array<i32>} : memref<1x8x128xf32, #tpu.memory_space<vmem>>, vector<1x8x128xf32>,
    %c0_13 = arith.constant 0 : index
    %c0_14 = arith.constant 0 : index
    %c0_15 = arith.constant 0 : index
    %21 = vector.load %arg5[%c0_13, %c0_14, %c0_15] : memref<1x8x128xf32, #tpu.memory_space<vmem>>, vector<1x8x128xf32>
    %22 = vector.shape_cast %21 : vector<1x8x128xf32> to vector<8x128xf32>
    %23 = arith.addf %10, %11 : vector<16x128xf32>
    %24 = vector.shape_cast %23 : vector<16x128xf32> to vector<2x8x128xf32>
    %cst_16 = arith.constant dense<0.000000e+00> : vector<8x128xf32>
    %25 = vector.multi_reduction <add>, %24, %cst_16 [0] : vector<2x8x128xf32> to vector<8x128xf32>
    %26 = arith.addf %22, %25 : vector<8x128xf32>
    %c0_17 = arith.constant 0 : index
    %c0_18 = arith.constant 0 : index
    %c0_19 = arith.constant 0 : index
    %27 = vector.load %arg5[%c0_17, %c0_18, %c0_19] : memref<1x8x128xf32, #tpu.memory_space<vmem>>, vector<1x8x128xf32>
    %28 = vector.shape_cast %27 : vector<1x8x128xf32> to vector<8x128xf32>
    %29 = vector.shape_cast %26 : vector<8x128xf32> to vector<1x8x128xf32>
    tpu.vector_store %arg5[%c0_17, %c0_18, %c0_19], %29 {strides = array<i32>} : memref<1x8x128xf32, #tpu.memory_space<vmem>>, vector<1x8x128xf32>,
    return
  }
  func.func @transform_0(%arg0: i32, %arg1: i32) -> (i32, i32) {
    %c1_i32 = arith.constant 1 : i32
    %0 = arith.muli %arg0, %c1_i32 : i32
    %1 = arith.addi %0, %arg1 : i32
    %c0_i32 = arith.constant 0 : i32
    %c0_i32_0 = arith.constant 0 : i32
    return %1, %c0_i32 : i32, i32
  }
  func.func @transform_1(%arg0: i32, %arg1: i32) -> (i32, i32) {
    %c1_i32 = arith.constant 1 : i32
    %0 = arith.muli %arg0, %c1_i32 : i32
    %1 = arith.addi %0, %arg1 : i32
    %c0_i32 = arith.constant 0 : i32
    %c0_i32_0 = arith.constant 0 : i32
    return %1, %c0_i32 : i32, i32
  }
  func.func @transform_2(%arg0: i32, %arg1: i32) -> (i32, i32, i32) {
    %c0_i32 = arith.constant 0 : i32
    %c0_i32_0 = arith.constant 0 : i32
    %c0_i32_1 = arith.constant 0 : i32
    return %arg0, %c0_i32, %c0_i32_0 : i32, i32, i32
  }
  func.func @transform_3(%arg0: i32, %arg1: i32) -> (i32, i32, i32) {
    %c0_i32 = arith.constant 0 : i32
    %c0_i32_0 = arith.constant 0 : i32
    %c0_i32_1 = arith.constant 0 : i32
    return %arg0, %c0_i32, %c0_i32_0 : i32, i32, i32
  }
}

</mosaic_0001>

<bundles_post_ra>
// kernel: tpu_custom_call.1
= control target key start
LH: loop header
LB: loop body
LE: loop exit
PB: predicated region body
PF: predicated region fallthrough
CT: control target
= control target key end

     0   :  { %9 = vsyncpa [#allocation3], 0  ;;  %s296_s0 = inlined_call_operand.hbm [shape: f32[16,128], index: 0, kind: input, shape index: {}]   ;;  %s297_s1 = inlined_call_operand.hbm [shape: f32[16,128], index: 1, kind: input, shape index: {}]   ;;  %s298_s2 = inlined_call_operand.hbm [shape: f32[1,8,128], index: 2, kind: output, shape index: {0}]   ;;  %s299_s3 = inlined_call_operand.hbm [shape: f32[1,8,128], index: 3, kind: output, shape index: {1}]  }
   0x1   :  { %10 = vsyncpa [#allocation6], 0 }
   0x2   :  { %11 = vsyncpa [#allocation4], 0 }
   0x3   :  { %12 = vsyncpa [#allocation9], 0  ;;  %s222_s12 = smov [#allocation2]   ;;  %s126_s16 = scalar_lea.hbm %s296_s0, 256 }
   0x4   :  { %s22_s13 = sshll.u32 %s222_s12, 4  ;;  %p127_p0 = scmp.ne.s32.totalorder %s296_s0, %s126_s16  ;;  %s23_s13 = int_to_ptr.vmem [resolvable:$true] %s22_s13 }
   0x5   :  { %p130_p1 = scmp.lt.u32.totalorder %s126_s16, %s296_s0 }
   0x7   :  { %p132_p2 = pnand %p130_p1, %p127_p0 }
   0x9   :  { %135 = shalt.err (!%p132_p2)
}
   0xa   :  { %s136_s21 = scalar_lea.vmem %s23_s13, 256  ;;  %p141_p4 = scmp.lt.s32.totalorder %s23_s13, %s23_s13 }
   0xb   :  { %p137_p3 = scmp.ne.s32.totalorder %s23_s13, %s136_s21  ;;  %p142_p5 = scmp.lt.s32.totalorder %s136_s21, %s136_s21 }
   0xd   :  { %p143_p6 = por %p142_p5, %p141_p4 }
   0xf   :  { %p144_p7 = pnand %p143_p6, %p137_p3 }
  0x11   :  { %147 = shalt.err (!%p144_p7)
}
  0x12   :  { %s223_s22 = smov 128   ;;  %s224_s23 = smov 8  }
  0x13   :  { %28 = dma.hbm_to_vmem [thread:$0]  %s296_s0, 256, %s23_s13, [#allocation3], %s223_s22, %s223_s22, %s224_s23  }
  0x14   :  { %s225_s26 = smov [#allocation5]   ;;  %s148_s30 = scalar_lea.hbm %s297_s1, 256 }
  0x15   :  { %s38_s27 = sshll.u32 %s225_s26, 4  ;;  %p149_p8 = scmp.ne.s32.totalorder %s297_s1, %s148_s30  ;;  %s39_s27 = int_to_ptr.vmem [resolvable:$true] %s38_s27 }
  0x16   :  { %p152_p9 = scmp.lt.u32.totalorder %s148_s30, %s297_s1 }
  0x18   :  { %p154_p10 = pnand %p152_p9, %p149_p8 }
  0x1a   :  { %157 = shalt.err (!%p154_p10)
}
  0x1b   :  { %s158_s8 = scalar_lea.vmem %s39_s27, 256  ;;  %p163_p12 = scmp.lt.s32.totalorder %s39_s27, %s39_s27 }
  0x1c   :  { %p159_p11 = scmp.ne.s32.totalorder %s39_s27, %s158_s8  ;;  %p164_p13 = scmp.lt.s32.totalorder %s158_s8, %s158_s8 }
  0x1e   :  { %p165_p0 = por %p164_p13, %p163_p12 }
  0x20   :  { %p166_p1 = pnand %p165_p0, %p159_p11 }
  0x22   :  { %169 = shalt.err (!%p166_p1)
}
  0x23   :  { %44 = dma.hbm_to_vmem [thread:$0]  %s297_s1, 256, %s39_s27, [#allocation6], %s223_s22, %s223_s22, %s224_s23  }
  0x24   :  { %214 = dma.done.wait [#allocation3], 256  }
  0x25   :  { %215 = vsyncadd [#allocation3], 4294967040 }
  0x26   :  { %216 = dma.done.wait [#allocation6], 256  }
  0x27   :  { %217 = vsyncadd [#allocation6], 4294967040  ;;  %v61_v0 = vld [vmem:[#allocation2] sm:$0xff]  ;;  %v62_v1 = vld [vmem:[#allocation2 + $0x8] sm:$0xff]  ;;  %s226_s1 = smov [#allocation7]   ;;  %s227_s11 = smov [#allocation8]  }
  0x28   :  { %v63_v2 = vmul.f32 0.5, %v61_v0  ;;  %v64_v3 = vmul.f32 0.5, %v62_v1  ;;  %v71_v8 = vld [vmem:[#allocation5] sm:$0xff]  ;;  %v72_v10 = vld [vmem:[#allocation5 + $0x8] sm:$0xff]  ;;  %s91_s10 = sshll.u32 %s226_s1, 4  ;;  %s101_s12 = sshll.u32 %s227_s11, 4  ;;  %s92_s10 = int_to_ptr.vmem [resolvable:$true] %s91_s10  ;;  %s102_s12 = int_to_ptr.vmem [resolvable:$true] %s101_s12 }
  0x29   :  { %s170_s13 = scalar_lea.vmem %s92_s10, 128  ;;  %p175_p3 = scmp.lt.s32.totalorder %s92_s10, %s92_s10 }
  0x2a   :  { %122 = vtanh.f32 %v63_v2  ;;  %p171_p2 = scmp.ne.s32.totalorder %s92_s10, %s170_s13  ;;  %p176_p4 = scmp.lt.s32.totalorder %s170_s13, %s170_s13 }
  0x2b   :  { %124 = vtanh.f32 %v64_v3 }
  0x2c   :  { %p177_p5 = por %p176_p4, %p175_p3 }
  0x2e   :  { %p178_p6 = pnand %p177_p5, %p171_p2 }
  0x34   :  { %v123_v4 = vpop.eup %122 }
  0x35   :  { %v125_v5 = vpop.eup %124  ;;  %v67_v6 = vadd.f32 1.0, %v123_v4 }
  0x36   :  { %v68_v7 = vadd.f32 1.0, %v125_v5 }
  0x37   :  { %v69_v9 = vmul.f32 0.5, %v67_v6 }
  0x38   :  { %v70_v11 = vmul.f32 0.5, %v68_v7 }
  0x39   :  { %v74_v12 = vmul.f32 %v71_v8, %v69_v9  ;;  %v80_v13 = vadd.f32 %v71_v8, %v69_v9 }
  0x3a   :  { %v75_v14 = vmul.f32 %v72_v10, %v70_v11  ;;  %v81_v15 = vadd.f32 %v72_v10, %v70_v11 }
  0x3c   :  { %v76_v16 = vadd.f32 %v75_v14, %v74_v12  ;;  %v82_v17 = vadd.f32 %v81_v15, %v80_v13 }
  0x3e   :  { %78 = vst [vmem:[#allocation7] sm:$0xff] %v76_v16  ;;  %84 = vst [vmem:[#allocation8] sm:$0xff] %v82_v17 }
  0x3f   :  { %181 = shalt.err (!%p178_p6)
}
  0x40   :  { %s182_s16 = scalar_lea.hbm %s298_s2, 128 }
  0x41   :  { %p183_p7 = scmp.ne.s32.totalorder %s298_s2, %s182_s16  ;;  %p186_p8 = scmp.lt.u32.totalorder %s182_s16, %s298_s2 }
  0x43   :  { %p188_p9 = pnand %p186_p8, %p183_p7 }
  0x45   :  { %191 = shalt.err (!%p188_p9)
}
  0x46   :  { %94 = dma.vmem_to_hbm [thread:$0]  %s92_s10, 128, %s298_s2, [#allocation4]  }
  0x47   :  { %s192_s23 = scalar_lea.vmem %s102_s12, 128  ;;  %p197_p11 = scmp.lt.s32.totalorder %s102_s12, %s102_s12 }
  0x48   :  { %p193_p10 = scmp.ne.s32.totalorder %s102_s12, %s192_s23  ;;  %p198_p12 = scmp.lt.s32.totalorder %s192_s23, %s192_s23 }
  0x4a   :  { %p199_p13 = por %p198_p12, %p197_p11 }
  0x4c   :  { %p200_p0 = pnand %p199_p13, %p193_p10 }
  0x4e   :  { %203 = shalt.err (!%p200_p0)
}
  0x4f   :  { %s204_s26 = scalar_lea.hbm %s299_s3, 128 }
  0x50   :  { %p205_p1 = scmp.ne.s32.totalorder %s299_s3, %s204_s26  ;;  %p208_p2 = scmp.lt.u32.totalorder %s204_s26, %s299_s3 }
  0x52   :  { %p210_p3 = pnand %p208_p2, %p205_p1 }
  0x54   :  { %213 = shalt.err (!%p210_p3)
}
  0x55   :  { %104 = dma.vmem_to_hbm [thread:$0]  %s102_s12, 128, %s299_s3, [#allocation9]  }
  0x56   :  { %218 = dma.done.wait [#allocation4], 128  }
  0x57   :  { %219 = vsyncadd [#allocation4], 4294967168 }
  0x58   :  { %220 = dma.done.wait [#allocation9], 128  }
  0x59   :  { %221 = vsyncadd [#allocation9], 4294967168 }
  0x5a   :  { %111 = vsyncpa [#allocation3], 1 }
  0x5b   :  { %112 = vsyncpa [#allocation6], 1 }
  0x5c   :  { %113 = vsyncpa [#allocation4], 1 }
  0x5d   :  { %114 = vsyncpa [#allocation9], 1 }

</bundles_post_ra>
